<compile_context>
chip_gen: v6e
topology: v6e:2x2x1
jax: 0.10.0
libtpu: 0.0.40
codegen_flags: <defaults>
</compile_context>

<pallas_src>
import functools

import jax
import jax.numpy as jnp
from jax.experimental import pallas as pl
from jax.experimental.pallas import tpu as pltpu

_SUBLANE = 8            # sublane alignment for the second-to-last dim
_TM_CAP = 1024          # max rows per tile (tiles are tiny: 1024*14*4B = 56 KiB)
_PALLAS_MIN_ROWS = 512  # below this, plain XLA is cheaper than a kernel launch


def _round_up(x: int, m: int) -> int:
    return ((x + m - 1) // m) * m


def _linear_kernel(x_ref, w_ref, b_ref, o_ref):
    # MXU matmul with f32 accumulation + broadcasted bias add on the VPU.
    acc = jnp.dot(x_ref[...], w_ref[...], preferred_element_type=jnp.float32)
    o_ref[...] = (acc + b_ref[...]).astype(o_ref.dtype)


def _pallas_linear(x, w_t, b):
    """Row-tiled, unpadded Pallas linear.  x:(R,K) w_t:(K,N) b:(1,N) -> (R,N)."""
    rows, k = x.shape
    n = w_t.shape[1]

    # --- tile selection ------------------------------------------------------
    # At least 2 grid steps when the batch can be split (v7x megacore keeps both
    # TensorCores busy), at most _TM_CAP rows per tile, tile a multiple of 8.
    rows8 = _round_up(rows, _SUBLANE)
    min_steps = 2 if rows8 >= 2 * _SUBLANE else 1
    n_steps = max(min_steps, pl.cdiv(rows8, _TM_CAP))
    tm = _round_up(pl.cdiv(rows8, n_steps), _SUBLANE)
    grid = (pl.cdiv(rows, tm),)   # last block may overhang; Pallas masks it

    itemsize = jnp.dtype(x.dtype).itemsize
    cost = pl.CostEstimate(
        flops=2 * rows * k * n,
        transcendentals=0,
        bytes_accessed=(rows * k + k * n + n + rows * n) * itemsize,
    )

    return pl.pallas_call(
        _linear_kernel,
        out_shape=jax.ShapeDtypeStruct((rows, n), x.dtype),
        grid_spec=pl.GridSpec(
            grid=grid,
            in_specs=[
                pl.BlockSpec((tm, k), lambda i: (i, 0)),   # x tile, pipelined
                pl.BlockSpec((k, n), lambda i: (0, 0)),    # weight, resident
                pl.BlockSpec((1, n), lambda i: (0, 0)),    # bias, resident
            ],
            out_specs=pl.BlockSpec((tm, n), lambda i: (i, 0)),
        ),
        compiler_params=pltpu.CompilerParams(
            dimension_semantics=("parallel",),
        ),
        cost_estimate=cost,
    )(x, w_t, b)


@functools.partial(jax.jit, static_argnames=("force_pallas",))
def joint_network_forward(x, w_t, b, force_pallas: bool = False):
    """Forward pass of JointNetwork.

    x   : (batch, in_features)   float32
    w_t : (in_features, joints)  float32  (transpose of the PyTorch weight)
    b   : (1, joints)            float32
    returns (batch, joints) float32
    """
    rows = x.shape[0]
    if not force_pallas and rows < _PALLAS_MIN_ROWS:
        # Tiny problem: a Pallas launch is pure overhead; let XLA inline it.
        return x @ w_t + b
    return _pallas_linear(x, w_t, b)


def make_joint_network_params(key, joints: int, minimal: bool):
    """Deterministic parameter init mirroring nn.Linear's shapes.

    PyTorch nn.Linear(in_features, joints): weight (joints, in_features),
    bias (joints,).  We store the weight transposed as (in_features, joints).
    Init follows PyTorch's default U(-1/sqrt(in_features), 1/sqrt(in_features)).
    """
    in_features = 6 if minimal else joints + 6
    k_w, k_b = jax.random.split(key)
    bound = 1.0 / jnp.sqrt(jnp.float32(in_features))
    w = jax.random.uniform(
        k_w, (joints, in_features), dtype=jnp.float32, minval=-bound, maxval=bound
    )
    b = jax.random.uniform(
        k_b, (joints,), dtype=jnp.float32, minval=-bound, maxval=bound
    )
    return w.T, b.reshape(1, joints)


# TODO(synk): loss / Adam optimizer / calculate_score from the PyTorch module are
# training-loop / host-side utilities, not part of the forward pass, so they are
# intentionally not ported to Pallas.

if __name__ == "__main__":
    joints = 8
    minimal = False
    in_features = 6 if minimal else joints + 6  # 14

    key = jax.random.PRNGKey(0)
    k_params, k_x_big, k_x_small, k_x_odd = jax.random.split(key, 4)

    w_t, b = make_joint_network_params(k_params, joints, minimal)

    # --- Pallas path: batch large enough that row tiling / the 2-step grid engage.
    batch = 256
    x = jax.random.normal(k_x_big, (batch, in_features), dtype=jnp.float32)
    out = jax.block_until_ready(joint_network_forward(x, w_t, b, force_pallas=True))
    ref = x @ w_t + b
    assert out.shape == (batch, joints)
    assert jnp.allclose(out, ref, atol=1e-5, rtol=1e-5), "mismatch vs reference (pallas path)"

    # --- Pallas path with a batch that is NOT a multiple of the tile (masked last block).
    batch_odd = 200
    x_odd = jax.random.normal(k_x_odd, (batch_odd, in_features), dtype=jnp.float32)
    out_odd = jax.block_until_ready(joint_network_forward(x_odd, w_t, b, force_pallas=True))
    ref_odd = x_odd @ w_t + b
    assert out_odd.shape == (batch_odd, joints)
    assert jnp.allclose(out_odd, ref_odd, atol=1e-5, rtol=1e-5), "mismatch (odd-batch pallas path)"

    # --- Tiny-batch path (matches the module's typical per-step use): plain XLA fallback.
    x_small = jax.random.normal(k_x_small, (8, in_features), dtype=jnp.float32)
    out_small = jax.block_until_ready(joint_network_forward(x_small, w_t, b))
    ref_small = x_small @ w_t + b
    assert out_small.shape == (8, joints)
    assert jnp.allclose(out_small, ref_small, atol=1e-5, rtol=1e-5), "mismatch (small path)"

    print("KERNEL_OK")
</pallas_src>

<mosaic_0001>
module attributes {stable_mosaic.version = 11 : i64} {
  func.func @_linear_kernel(%arg0: i32, %arg1: memref<128x14xf32, #tpu.memory_space<vmem>>, %arg2: memref<14x8xf32, #tpu.memory_space<vmem>>, %arg3: memref<1x8xf32, #tpu.memory_space<vmem>>, %arg4: memref<128x8xf32, #tpu.memory_space<vmem>>) attributes {dimension_semantics = [#tpu.dimension_semantics<parallel>], iteration_bounds = array<i64: 2>, scalar_prefetch = 0 : i64, scratch_operands = 0 : i64, tpu.core_type = #tpu.core_type<tc>, window_params = [{transform_indices = @transform_0, window_bounds = array<i64: 128, 14>}, {pipeline_mode = #tpu.pipeline_mode<synchronous>, transform_indices = @transform_1, window_bounds = array<i64: 14, 8>}, {pipeline_mode = #tpu.pipeline_mode<synchronous>, transform_indices = @transform_2, window_bounds = array<i64: 1, 8>}, {transform_indices = @transform_3, window_bounds = array<i64: 128, 8>}]} {
    %c0 = arith.constant 0 : index
    %c0_0 = arith.constant 0 : index
    %0 = vector.load %arg1[%c0, %c0_0] : memref<128x14xf32, #tpu.memory_space<vmem>>, vector<128x14xf32>
    %c0_1 = arith.constant 0 : index
    %c0_2 = arith.constant 0 : index
    %1 = vector.load %arg2[%c0_1, %c0_2] : memref<14x8xf32, #tpu.memory_space<vmem>>, vector<14x8xf32>
    %cst = arith.constant dense<0.000000e+00> : vector<128x8xf32>
    %2 = tpu.matmul %0, %1, %cst {dimension_numbers = #tpu.dot_dimension_numbers<[1], [0], [0], [1], [0, 0, 1, 1], [], []>} : vector<128x14xf32>, vector<14x8xf32>, vector<128x8xf32> -> vector<128x8xf32>
    %c0_3 = arith.constant 0 : index
    %c0_4 = arith.constant 0 : index
    %3 = vector.load %arg3[%c0_3, %c0_4] : memref<1x8xf32, #tpu.memory_space<vmem>>, vector<1x8xf32>
    %4 = vector.broadcast %3 : vector<1x8xf32> to vector<128x8xf32>
    %5 = arith.addf %2, %4 : vector<128x8xf32>
    %c0_5 = arith.constant 0 : index
    %c0_6 = arith.constant 0 : index
    %6 = vector.load %arg4[%c0_5, %c0_6] : memref<128x8xf32, #tpu.memory_space<vmem>>, vector<128x8xf32>
    tpu.vector_store %arg4[%c0_5, %c0_6], %5 {strides = array<i32>} : memref<128x8xf32, #tpu.memory_space<vmem>>, vector<128x8xf32>,
    return
  }
  func.func @transform_0(%arg0: i32) -> (i32, i32) {
    %c0_i32 = arith.constant 0 : i32
    %c0_i32_0 = arith.constant 0 : i32
    return %arg0, %c0_i32 : i32, i32
  }
  func.func @transform_1(%arg0: i32) -> (i32, i32) {
    %c0_i32 = arith.constant 0 : i32
    %c0_i32_0 = arith.constant 0 : i32
    %c0_i32_1 = arith.constant 0 : i32
    return %c0_i32, %c0_i32_0 : i32, i32
  }
  func.func @transform_2(%arg0: i32) -> (i32, i32) {
    %c0_i32 = arith.constant 0 : i32
    %c0_i32_0 = arith.constant 0 : i32
    %c0_i32_1 = arith.constant 0 : i32
    return %c0_i32, %c0_i32_0 : i32, i32
  }
  func.func @transform_3(%arg0: i32) -> (i32, i32) {
    %c0_i32 = arith.constant 0 : i32
    %c0_i32_0 = arith.constant 0 : i32
    return %arg0, %c0_i32 : i32, i32
  }
}

</mosaic_0001>

<bundles_post_ra>
// kernel: joint_network_forward.1
= control target key start
LH: loop header
LB: loop body
LE: loop exit
PB: predicated region body
PF: predicated region fallthrough
CT: control target
= control target key end

     0   :  { %s585_s12 = smov 0   ;;  %s668_s0 = inlined_call_operand.vmem [shape: f32[256,14], index: 0, kind: input, shape index: {}]   ;;  %s669_s1 = inlined_call_operand.vmem [shape: f32[14,8], index: 1, kind: input, shape index: {}]   ;;  %s670_s2 = inlined_call_operand.vmem [shape: f32[1,8], index: 2, kind: input, shape index: {}]   ;;  %s671_s3 = inlined_call_operand.vmem [shape: f32[256,8], index: 3, kind: output, shape index: {}]  }
   0x1 LB: > { %s470_s13 = sadd.s32 4294967295, %s563_s12   ;;  %p474_p0 = scmp.ge.s32.totalorder %s563_s12, 1  ;;  %s563_s12 = sphi %s585_s12, %s13_s12  }
   0x2   : > { %p138_p1 = scmp.lt.s32.totalorder %s563_s12, 3 }
   0x4   : > { %p139_p2 = pnand %p474_p0, %p138_p1 }
   0x5   : > { %s475_s18 = sshll.u32 (!%p139_p2), %s470_s13, 4 }
   0x6   : > { %142 = sbr.rel (%p139_p2) target bundleno = 227 (0xe3), region = 32  ;;  %p163_p3 = scmp.lt.s32.totalorder (!%p139_p2), %s475_s18, 31 }
   0xb   : > { %v191_v0 = vld [vmem:[%s669_s1 + $0x8] sm:$0x3f]  ;;  %vm248_vm0 = vcmask 1045504   ;;  %v190_v1 = vld [vmem:[%s669_s1] sm:$0xff]  ;;  %s673_s18 = smov (!%p163_p3, %s475_s18), 31  ;;  %vm199_vm1 = vcmask 113664  }
   0xc   : > { %517 = vmatprep.subr.msk.mxu0 %vm248_vm0, %v191_v0  ;;  %545 = vmatprep.subr.msk.mxu1 %vm248_vm0, %v191_v0  ;;  %s476_s19 = sshll.u32 %s673_s18, 3  ;;  %v479_v18 = vld [vmem:[%s670_s2] ss:$0 sm:$0xff]  ;;  %vm397_vm2 = vcmask 64512  }
   0xd   : > { %518 = vmatpush3.msk.msra.mxu0 %vm248_vm0, %v191_v0  ;;  %547 = vmatpush3.msk.msra.mxu1 %vm248_vm0, %v191_v0  ;;  %s166_s22 = scalar_lea.vmem %s668_s0, %s476_s19  ;;  %s631_s27 = scalar_lea.vmem %s671_s3, %s476_s19 }
   0xe   : > { %519 = vmatprep.subr.mxu0 %v190_v1  ;;  %546 = vmatprep.subr.mxu1 %v190_v1  ;;  %v174_v2 = vld [vmem:[%s166_s22] sm:$0xff]  ;;  %v175_v4 = vld [vmem:[%s166_s22 + $0x8] sm:$0xff]  ;;  %v176_v6 = vld [vmem:[%s166_s22 + $0x10] sm:$0xff] }
   0xf   : > { %520 = vmatpush3.msra.mxu0 %v190_v1  ;;  %548 = vmatpush3.msra.mxu1 %v190_v1  ;;  %v182_v3 = vld [vmem:[%s166_s22 + $0x40] sm:$0xff]  ;;  %v183_v5 = vld [vmem:[%s166_s22 + $0x48] sm:$0xff]  ;;  %v184_v7 = vld [vmem:[%s166_s22 + $0x50] sm:$0xff] }
  0x10   : > { %521 = vmatprep.mubr.msk.f32.mxu0 %vm199_vm1, %v174_v2  ;;  %533 = vmatprep.mubr.msk.f32.mxu1 %vm199_vm1, %v182_v3  ;;  %v177_v8 = vld [vmem:[%s166_s22 + $0x18] sm:$0xff]  ;;  %v178_v10 = vld [vmem:[%s166_s22 + $0x20] sm:$0xff]  ;;  %v179_v12 = vld [vmem:[%s166_s22 + $0x28] sm:$0xff] }
  0x11   : > { %522 = vmatmul.mubr.msk.f32.vlgmr.msra.gmra.mxu0 %vm199_vm1, %v175_v4  ;;  %534 = vmatmul.mubr.msk.f32.vlgmr.msra.gmra.mxu1 %vm199_vm1, %v183_v5  ;;  %v185_v9 = vld [vmem:[%s166_s22 + $0x58] sm:$0xff]  ;;  %v186_v11 = vld [vmem:[%s166_s22 + $0x60] sm:$0xff]  ;;  %v187_v13 = vld [vmem:[%s166_s22 + $0x68] sm:$0xff] }
  0x12   : > { %524 = vmatprep.mubr.msk.f32.mxu0 %vm199_vm1, %v176_v6  ;;  %536 = vmatprep.mubr.msk.f32.mxu1 %vm199_vm1, %v184_v7  ;;  %v180_v14 = vld [vmem:[%s166_s22 + $0x30] sm:$0xff]  ;;  %v181_v16 = vld [vmem:[%s166_s22 + $0x38] sm:$0xff] }
  0x13   : > { %v188_v15 = vld [vmem:[%s166_s22 + $0x70] sm:$0xff]  ;;  %v189_v17 = vld [vmem:[%s166_s22 + $0x78] sm:$0xff] }
  0x15   : > { %525 = vmatmul.mubr.msk.f32.gmra.mxu0 %vm199_vm1, %v177_v8  ;;  %537 = vmatmul.mubr.msk.f32.gmra.mxu1 %vm199_vm1, %v185_v9 }
  0x16   : > { %527 = vmatprep.mubr.msk.f32.mxu0 %vm199_vm1, %v178_v10  ;;  %539 = vmatprep.mubr.msk.f32.mxu1 %vm199_vm1, %v186_v11 }
  0x19   : > { %528 = vmatmul.mubr.msk.f32.gmra.mxu0 %vm199_vm1, %v179_v12  ;;  %540 = vmatmul.mubr.msk.f32.gmra.mxu1 %vm199_vm1, %v187_v13 }
  0x1a   : > { %530 = vmatprep.mubr.msk.f32.mxu0 %vm199_vm1, %v180_v14  ;;  %542 = vmatprep.mubr.msk.f32.mxu1 %vm199_vm1, %v188_v15 }
  0x1d   : > { %531 = vmatmul.mubr.msk.f32.gmra.mxu0 %vm199_vm1, %v181_v16  ;;  %543 = vmatmul.mubr.msk.f32.gmra.mxu1 %vm199_vm1, %v189_v17 }
  0xd1   : > { %v523_v19 = vpop.f32.mrf.mxu0  ;;  %v535_v20 = vpop.f32.mrf.mxu1 }
  0xd2   : > { %v324_v21 = vadd.f32 %v523_v19, %v479_v18  ;;  %v364_v22 = vadd.f32 %v535_v20, %v479_v18 }
  0xd3   : > { %v318_v23 = vpop.f32.mrf.mxu0  ;;  %v358_v24 = vpop.f32.mrf.mxu1 }
  0xd4   : > { %399 = vst.msk [vmem:[%s631_s27 + $0x8] sm:$0xff] %vm397_vm2, %v324_v21  ;;  %407 = vst.msk [vmem:[%s631_s27 + $0x48] sm:$0xff] %vm397_vm2, %v364_v22  ;;  %v319_v25 = vadd.f32 %v479_v18, %v318_v23  ;;  %v359_v26 = vadd.f32 %v479_v18, %v358_v24 }
  0xd5   : > { %v526_v27 = vpop.f32.mrf.mxu0  ;;  %v538_v28 = vpop.f32.mrf.mxu1 }
  0xd6   : > { %398 = vst.msk [vmem:[%s631_s27] sm:$0xff] %vm397_vm2, %v319_v25  ;;  %406 = vst.msk [vmem:[%s631_s27 + $0x40] sm:$0xff] %vm397_vm2, %v359_v26  ;;  %v334_v29 = vadd.f32 %v526_v27, %v479_v18  ;;  %v374_v30 = vadd.f32 %v538_v28, %v479_v18 }
  0xd7   : > { %v328_v31 = vpop.f32.mrf.mxu0  ;;  %v368_v32 = vpop.f32.mrf.mxu1 }
  0xd8   : > { %401 = vst.msk [vmem:[%s631_s27 + $0x18] sm:$0xff] %vm397_vm2, %v334_v29  ;;  %409 = vst.msk [vmem:[%s631_s27 + $0x58] sm:$0xff] %vm397_vm2, %v374_v30  ;;  %v329_v33 = vadd.f32 %v479_v18, %v328_v31  ;;  %v369_v34 = vadd.f32 %v479_v18, %v368_v32 }
  0xd9   : > { %v529_v35 = vpop.f32.mrf.mxu0  ;;  %v541_v36 = vpop.f32.mrf.mxu1 }
  0xda   : > { %400 = vst.msk [vmem:[%s631_s27 + $0x10] sm:$0xff] %vm397_vm2, %v329_v33  ;;  %408 = vst.msk [vmem:[%s631_s27 + $0x50] sm:$0xff] %vm397_vm2, %v369_v34  ;;  %v344_v37 = vadd.f32 %v529_v35, %v479_v18  ;;  %v384_v38 = vadd.f32 %v541_v36, %v479_v18 }
  0xdb   : > { %v338_v39 = vpop.f32.mrf.mxu0  ;;  %v378_v40 = vpop.f32.mrf.mxu1 }
  0xdc   : > { %403 = vst.msk [vmem:[%s631_s27 + $0x28] sm:$0xff] %vm397_vm2, %v344_v37  ;;  %411 = vst.msk [vmem:[%s631_s27 + $0x68] sm:$0xff] %vm397_vm2, %v384_v38  ;;  %v339_v41 = vadd.f32 %v479_v18, %v338_v39  ;;  %v379_v42 = vadd.f32 %v479_v18, %v378_v40 }
  0xdd   : > { %v532_v43 = vpop.f32.mrf.mxu0  ;;  %v544_v44 = vpop.f32.mrf.mxu1 }
  0xde   : > { %402 = vst.msk [vmem:[%s631_s27 + $0x20] sm:$0xff] %vm397_vm2, %v339_v41  ;;  %410 = vst.msk [vmem:[%s631_s27 + $0x60] sm:$0xff] %vm397_vm2, %v379_v42  ;;  %v354_v45 = vadd.f32 %v532_v43, %v479_v18  ;;  %v394_v46 = vadd.f32 %v544_v44, %v479_v18 }
  0xdf   : > { %v348_v47 = vpop.f32.mrf.mxu0  ;;  %v388_v48 = vpop.f32.mrf.mxu1 }
  0xe0   : > { %405 = vst.msk [vmem:[%s631_s27 + $0x38] sm:$0xff] %vm397_vm2, %v354_v45  ;;  %413 = vst.msk [vmem:[%s631_s27 + $0x78] sm:$0xff] %vm397_vm2, %v394_v46  ;;  %v349_v49 = vadd.f32 %v479_v18, %v348_v47  ;;  %v389_v50 = vadd.f32 %v479_v18, %v388_v48 }
  0xe2   : > { %404 = vst.msk [vmem:[%s631_s27 + $0x30] sm:$0xff] %vm397_vm2, %v349_v49  ;;  %412 = vst.msk [vmem:[%s631_s27 + $0x70] sm:$0xff] %vm397_vm2, %v389_v50 }
  0xe3 PF: > { %s13_s12 = sadd.s32 1, %s563_s12  }
  0xe4   : > { %p10_p4 = scmp.ge.s32.totalorder %s13_s12, 4  }
  0xe6   :  { %12 = sbr.rel (!%p10_p4) target bundleno = 1 (0x1), region = 62 }

</bundles_post_ra>
